<compile_context>
chip_gen: v6e
topology: v6e:2x2x1
jax: 0.10.0
libtpu: 0.0.40
codegen_flags: <defaults>
</compile_context>

<pallas_src>
import functools
from typing import NamedTuple

import jax
import jax.numpy as jnp
from jax.experimental import pallas as pl
from jax.experimental.pallas import tpu as pltpu

A_WEIGHT = 0.4
B_WEIGHT = 0.3
BN_EPS = 1e-5


def _round_up(x, m):
    return (x + m - 1) // m * m


def _choose_tile(total, max_tile):
    """Largest multiple of 128 that divides `total` (a multiple of 128) and is <= max_tile."""
    t = min(max_tile, total)
    t -= t % 128
    while total % t:
        t -= 128
    return t


def _device_config():
    """Per-generation max K tile, decoder N tile, and scoped-VMEM cap."""
    try:
        kind = jax.devices()[0].device_kind.lower()
    except Exception:
        kind = ""
    if "v5" in kind:
        # v5e: 4x128 MXU, 128 MiB VMEM -> narrower decoder tiles, generous cap.
        return {"tk": 512, "tn_dec": 512, "vmem_cap": 100 << 20}
    if "v6" in kind:
        # v6e: 2x256 MXU, 128 MiB VMEM -> widest decoder tiles.
        return {"tk": 512, "tn_dec": 1024, "vmem_cap": 100 << 20}
    # v7x (64 MiB VMEM per TC) and unknown devices: conservative cap.
    return {"tk": 512, "tn_dec": 512, "vmem_cap": 48 << 20}


class Geom(NamedTuple):
    D1: int
    D2: int
    L: int
    D1k: int
    D2k: int
    tk: int
    kt1: int
    kt2: int
    Lp: int
    N1p: int
    N2p: int
    Ncat: int
    tn_dec: int
    vmem_cap: int


# --------------------------------------------------------------------------
# Shared BN + sigmoid epilogue (runs inside the kernels, all f32)
# --------------------------------------------------------------------------
def _bn_sigmoid(h, gamma, beta, batch, inv_batch):
    """Train-mode BatchNorm1d (biased variance, eps=1e-5) + sigmoid.

    Padded batch rows of `h` are exact zeros, so sum(h)/batch is the exact
    batch mean; for the variance they are explicitly masked out (two-pass
    centered variance -> no E[h^2]-mu^2 cancellation)."""
    mu = jnp.sum(h, axis=0, keepdims=True) * inv_batch
    row = jax.lax.broadcasted_iota(jnp.int32, (h.shape[0], 1), 0)
    hc = jnp.where(row < batch, h - mu, 0.0)
    var = jnp.sum(hc * hc, axis=0, keepdims=True) * inv_batch
    hn = hc * jax.lax.rsqrt(var + BN_EPS) * gamma + beta
    # sigmoid with the divide on the EUP slot (exp is EUP already).
    return pl.reciprocal(1.0 + jnp.exp(-hn), approx=True)


# --------------------------------------------------------------------------
# Kernel 1a: grid-free fused dual encoder (small-problem fast path)
# --------------------------------------------------------------------------
def _encoder_small_kernel(x1_ref, x2_ref, w_ref, g1_ref, bt1_ref, g2_ref, bt2_ref,
                          lat_f32_ref, lat_bf16_ref,
                          *, d1k, d2k, batch, inv_batch, a, b):
    w1 = w_ref[pl.ds(0, d1k), :]
    w2 = w_ref[pl.ds(d1k, d2k), :]
    h1 = jnp.dot(x1_ref[...], w1, preferred_element_type=jnp.float32)
    h2 = jnp.dot(x2_ref[...], w2, preferred_element_type=jnp.float32)
    e1 = _bn_sigmoid(h1, g1_ref[...], bt1_ref[...], batch, inv_batch)
    e2 = _bn_sigmoid(h2, g2_ref[...], bt2_ref[...], batch, inv_batch)
    latent = a * e1 + b * e2
    lat_f32_ref[...] = latent                        # user-facing output
    lat_bf16_ref[...] = latent.astype(jnp.bfloat16)  # MXU input for decoder


# --------------------------------------------------------------------------
# Kernel 1b: K-tiled fused dual encoder (general path)
# --------------------------------------------------------------------------
def _encoder_tiled_kernel(x_ref, w_ref, g1_ref, bt1_ref, g2_ref, bt2_ref,
                          lat_f32_ref, lat_bf16_ref,
                          acc1_ref, acc2_ref, e1_ref,
                          *, kt1, batch, inv_batch, a, b):
    k = pl.program_id(0)

    @pl.when(k == 0)
    def _():
        acc1_ref[...] = jnp.zeros_like(acc1_ref)
        acc2_ref[...] = jnp.zeros_like(acc2_ref)

    # One MXU matmul per K tile (bf16 inputs, f32 accumulation), routed to the
    # accumulator of whichever encoder this K tile belongs to.
    prod = jnp.dot(x_ref[...], w_ref[...], preferred_element_type=jnp.float32)

    @pl.when(k < kt1)
    def _():
        acc1_ref[...] += prod

        # Encoder 1 is complete after step kt1-1: run its BN+sigmoid epilogue
        # early so the XLU/EUP work hides under encoder 2's MXU matmuls.
        @pl.when(k == kt1 - 1)
        def _():
            e1_ref[...] = _bn_sigmoid(acc1_ref[...], g1_ref[...], bt1_ref[...],
                                      batch, inv_batch)

    @pl.when(k >= kt1)
    def _():
        acc2_ref[...] += prod

    @pl.when(k == pl.num_programs(0) - 1)
    def _():
        e2 = _bn_sigmoid(acc2_ref[...], g2_ref[...], bt2_ref[...], batch, inv_batch)
        latent = a * e1_ref[...] + b * e2
        lat_f32_ref[...] = latent
        lat_bf16_ref[...] = latent.astype(jnp.bfloat16)


# --------------------------------------------------------------------------
# Kernel 2: fused dual decoder (N-tiled, lane-dense, latent resident)
# --------------------------------------------------------------------------
def _decoder_kernel(lat_ref, wd_ref, bd_ref, out_ref):
    out_ref[...] = (
        jnp.dot(lat_ref[...], wd_ref[...], preferred_element_type=jnp.float32)
        + bd_ref[...]
    )


# --------------------------------------------------------------------------
# One-time parameter packing (hoisted out of the per-call path)
# --------------------------------------------------------------------------
def prepack_params(params, in_feas_dim, latent_dim):
    """Pack weights / BN params into lane-dense, kernel-ready slabs ONCE."""
    cfg = _device_config()
    bf16, f32 = jnp.bfloat16, jnp.float32

    D1, D2 = int(in_feas_dim[0]), int(in_feas_dim[1])
    L = int(latent_dim)

    D1p, D2p = _round_up(D1, 128), _round_up(D2, 128)
    tk = min(cfg["tk"], D1p, D2p)
    D1k, D2k = _round_up(D1p, tk), _round_up(D2p, tk)
    Lp = _round_up(L, 128)
    N1p, N2p = _round_up(D1, 128), _round_up(D2, 128)
    Ncat = N1p + N2p
    tn_dec = _choose_tile(Ncat, cfg["tn_dec"])

    geom = Geom(D1=D1, D2=D2, L=L, D1k=D1k, D2k=D2k, tk=tk,
                kt1=D1k // tk, kt2=D2k // tk, Lp=Lp,
                N1p=N1p, N2p=N2p, Ncat=Ncat, tn_dec=tn_dec,
                vmem_cap=cfg["vmem_cap"])

    # Encoder weight slab, K-concatenated per encoder (linear biases be1/be2
    # are intentionally dropped: they cancel under train-mode BN mean subtraction).
    w_cat = jnp.zeros((D1k + D2k, Lp), bf16)
    w_cat = w_cat.at[:D1, :L].set(params["we1"].astype(bf16))
    w_cat = w_cat.at[D1k:D1k + D2, :L].set(params["we2"].astype(bf16))

    def pad_row(v, n, fill):
        out = jnp.full((1, n), fill, f32)
        return out.at[:, :v.size].set(jnp.reshape(v, (1, -1)).astype(f32))

    # Decoder weight / bias slabs, N-concatenated per decoder.
    wd_cat = jnp.zeros((Lp, Ncat), bf16)
    wd_cat = wd_cat.at[:L, :D1].set(params["wd1"].astype(bf16))
    wd_cat = wd_cat.at[:L, N1p:N1p + D2].set(params["wd2"].astype(bf16))

    bd_cat = jnp.zeros((1, Ncat), f32)
    bd_cat = bd_cat.at[:, :D1].set(jnp.reshape(params["bd1"], (1, -1)).astype(f32))
    bd_cat = bd_cat.at[:, N1p:N1p + D2].set(jnp.reshape(params["bd2"], (1, -1)).astype(f32))

    packed = {
        "w_cat": w_cat,
        "g1": pad_row(params["g1"], Lp, 1.0),
        "bt1": pad_row(params["bt1"], Lp, 0.0),
        "g2": pad_row(params["g2"], Lp, 1.0),
        "bt2": pad_row(params["bt2"], Lp, 0.0),
        "wd_cat": wd_cat,
        "bd_cat": bd_cat,
    }
    return packed, geom


# --------------------------------------------------------------------------
# Host wrapper
# --------------------------------------------------------------------------
def mmae_forward(omics_1, omics_2, packed, geom, a=A_WEIGHT, b=B_WEIGHT):
    """Returns (latent (B,L), decoded_omics_1 (B,D1), decoded_omics_2 (B,D2))."""
    bf16, f32 = jnp.bfloat16, jnp.float32
    B = omics_1.shape[0]
    D1, D2, L = geom.D1, geom.D2, geom.L
    D1k, D2k, Lp = geom.D1k, geom.D2k, geom.Lp
    Kt = D1k + D2k
    Bp = _round_up(B, 16)          # sublane-safe for both f32 and bf16 tiles
    inv_batch = 1.0 / float(B)
    cap = geom.vmem_cap

    bn_args = (packed["g1"], packed["bt1"], packed["g2"], packed["bt2"])

    # ------------------------------ encoder ---------------------------------
    enc_bytes = Bp * Kt * 2 + Kt * Lp * 2 + 4 * Lp * 4 + Bp * Lp * 6
    enc_cost = pl.CostEstimate(flops=2 * Bp * Kt * Lp,
                               transcendentals=2 * Bp * Lp,
                               bytes_accessed=enc_bytes)
    use_fast = (geom.kt1 + geom.kt2 <= 2) and (enc_bytes <= cap // 2)

    if use_fast:
        # Single-step fast path: everything resident, no grid machinery, no
        # x-slab concatenation.  The kernel slices the packed weight slab.
        x1p = jnp.zeros((Bp, D1k), bf16).at[:B, :D1].set(omics_1.astype(bf16))
        x2p = jnp.zeros((Bp, D2k), bf16).at[:B, :D2].set(omics_2.astype(bf16))
        lat_f32, lat_bf16 = pl.pallas_call(
            functools.partial(_encoder_small_kernel, d1k=D1k, d2k=D2k,
                              batch=B, inv_batch=inv_batch,
                              a=float(a), b=float(b)),
            out_shape=(jax.ShapeDtypeStruct((Bp, Lp), f32),
                       jax.ShapeDtypeStruct((Bp, Lp), bf16)),
            compiler_params=pltpu.CompilerParams(
                vmem_limit_bytes=int(min(max(2 * enc_bytes, 8 << 20), cap))),
            cost_estimate=enc_cost,
        )(x1p, x2p, packed["w_cat"], *bn_args)
    else:
        # K-tiled path: per-call packing of the activation slab only.
        x_cat = jnp.zeros((Bp, Kt), bf16)
        x_cat = x_cat.at[:B, :D1].set(omics_1.astype(bf16))
        x_cat = x_cat.at[:B, D1k:D1k + D2].set(omics_2.astype(bf16))

        tk, kt1, kt2 = geom.tk, geom.kt1, geom.kt2
        enc_vmem = (2 * (Bp * tk * 2 + tk * Lp * 2)   # double-buffered x/w tiles
                    + 4 * Lp * 4 * 2                  # gamma/beta
                    + Bp * Lp * (4 + 2) * 2           # latent outputs
                    + 3 * Bp * Lp * 4)                # acc1, acc2, e1 scratch

        lat_f32, lat_bf16 = pl.pallas_call(
            functools.partial(_encoder_tiled_kernel, kt1=kt1,
                              batch=B, inv_batch=inv_batch,
                              a=float(a), b=float(b)),
            out_shape=(jax.ShapeDtypeStruct((Bp, Lp), f32),
                       jax.ShapeDtypeStruct((Bp, Lp), bf16)),
            grid_spec=pltpu.PrefetchScalarGridSpec(
                num_scalar_prefetch=0,
                grid=(kt1 + kt2,),
                in_specs=[
                    pl.BlockSpec((Bp, tk), lambda k: (0, k)),   # x slab, K-tiled
                    pl.BlockSpec((tk, Lp), lambda k: (k, 0)),   # W slab, K-tiled
                    pl.BlockSpec((1, Lp), lambda k: (0, 0)),    # gamma1
                    pl.BlockSpec((1, Lp), lambda k: (0, 0)),    # beta1
                    pl.BlockSpec((1, Lp), lambda k: (0, 0)),    # gamma2
                    pl.BlockSpec((1, Lp), lambda k: (0, 0)),    # beta2
                ],
                out_specs=(pl.BlockSpec((Bp, Lp), lambda k: (0, 0)),
                           pl.BlockSpec((Bp, Lp), lambda k: (0, 0))),
                scratch_shapes=[pltpu.VMEM((Bp, Lp), f32),      # acc1
                                pltpu.VMEM((Bp, Lp), f32),      # acc2
                                pltpu.VMEM((Bp, Lp), f32)],     # e1 (early epilogue)
            ),
            compiler_params=pltpu.CompilerParams(
                dimension_semantics=("arbitrary",),
                vmem_limit_bytes=int(min(max(2 * enc_vmem, 8 << 20), cap))),
            cost_estimate=enc_cost,
        )(x_cat, packed["w_cat"], *bn_args)

    # ------------------------------ decoder ---------------------------------
    Ncat, N1p, tn = geom.Ncat, geom.N1p, geom.tn_dec
    dec_vmem = (2 * Bp * Lp * 2                       # resident latent
                + 2 * (Lp * tn * 2 + tn * 4 + Bp * tn * 4))
    dec_cost = pl.CostEstimate(
        flops=2 * Bp * Lp * Ncat, transcendentals=0,
        bytes_accessed=Bp * Lp * 2 + Lp * Ncat * 2 + Ncat * 4 + Bp * Ncat * 4)

    dec_cat = pl.pallas_call(
        _decoder_kernel,
        out_shape=jax.ShapeDtypeStruct((Bp, Ncat), f32),
        grid_spec=pltpu.PrefetchScalarGridSpec(
            num_scalar_prefetch=0,
            grid=(Ncat // tn,),
            in_specs=[
                pl.BlockSpec((Bp, Lp), lambda n: (0, 0)),   # latent, resident
                pl.BlockSpec((Lp, tn), lambda n: (0, n)),   # fused weights, N-tiled
                pl.BlockSpec((1, tn), lambda n: (0, n)),    # fused bias
            ],
            out_specs=pl.BlockSpec((Bp, tn), lambda n: (0, n)),
        ),
        compiler_params=pltpu.CompilerParams(
            dimension_semantics=("parallel",),
            vmem_limit_bytes=int(min(max(2 * dec_vmem, 8 << 20), cap))),
        cost_estimate=dec_cost,
    )(lat_bf16, packed["wd_cat"], packed["bd_cat"])

    latent = lat_f32[:B, :L]
    dec1 = dec_cat[:B, :D1]
    dec2 = dec_cat[:B, N1p:N1p + D2]
    return latent, dec1, dec2


# --------------------------------------------------------------------------
# Parameters / reference
# --------------------------------------------------------------------------
def init_params(key, in_feas_dim, latent_dim):
    """Mirror the PyTorch __init__: every 'weight' ~ N(0, 0.1) (incl. BN gamma),
    every 'bias' = 0 (incl. BN beta).  Linear weights stored as (in, out)."""
    d1, d2 = in_feas_dim
    L = latent_dim
    ks = jax.random.split(key, 6)
    normal = lambda k, shape: 0.1 * jax.random.normal(k, shape, dtype=jnp.float32)
    return {
        # encoder 1
        "we1": normal(ks[0], (d1, L)),
        "be1": jnp.zeros((1, L), jnp.float32),   # cancels under train-mode BN
        "g1":  normal(ks[1], (1, L)),
        "bt1": jnp.zeros((1, L), jnp.float32),
        # encoder 2
        "we2": normal(ks[2], (d2, L)),
        "be2": jnp.zeros((1, L), jnp.float32),
        "g2":  normal(ks[3], (1, L)),
        "bt2": jnp.zeros((1, L), jnp.float32),
        # decoders
        "wd1": normal(ks[4], (L, d1)),
        "bd1": jnp.zeros((1, d1), jnp.float32),
        "wd2": normal(ks[5], (L, d2)),
        "bd2": jnp.zeros((1, d2), jnp.float32),
    }


def mmae_reference(omics_1, omics_2, params, a=A_WEIGHT, b=B_WEIGHT):
    """Pure-JAX reference (PyTorch-faithful math, mirroring the kernel's
    bf16-input / f32-accumulate matmul precision)."""
    bf16, f32 = jnp.bfloat16, jnp.float32

    def enc(x, w, bias, g, bt):
        h = jnp.dot(x.astype(bf16), w.astype(bf16),
                    preferred_element_type=f32) + bias
        mu = jnp.mean(h, axis=0, keepdims=True)
        var = jnp.mean((h - mu) ** 2, axis=0, keepdims=True)
        hn = (h - mu) * jax.lax.rsqrt(var + BN_EPS) * g + bt
        return jax.nn.sigmoid(hn)

    e1 = enc(omics_1, params["we1"], params["be1"], params["g1"], params["bt1"])
    e2 = enc(omics_2, params["we2"], params["be2"], params["g2"], params["bt2"])
    latent = a * e1 + b * e2
    lat16 = latent.astype(bf16)
    dec1 = jnp.dot(lat16, params["wd1"].astype(bf16),
                   preferred_element_type=f32) + params["bd1"]
    dec2 = jnp.dot(lat16, params["wd2"].astype(bf16),
                   preferred_element_type=f32) + params["bd2"]
    return latent, dec1, dec2


# --------------------------------------------------------------------------
# Smoke test
# --------------------------------------------------------------------------
def _run_case(name, B, in_feas_dim, latent_dim, key):
    k1, k2, kp = jax.random.split(key, 3)
    omics_1 = jax.random.normal(k1, (B, in_feas_dim[0]), dtype=jnp.float32)
    omics_2 = jax.random.normal(k2, (B, in_feas_dim[1]), dtype=jnp.float32)
    params = init_params(kp, in_feas_dim, latent_dim)

    # Pack once (hoisted off the per-call path), forward many times.
    packed, geom = prepack_params(params, in_feas_dim, latent_dim)
    jax.block_until_ready(packed)

    fwd = jax.jit(functools.partial(mmae_forward, geom=geom))
    latent, dec1, dec2 = fwd(omics_1, omics_2, packed)
    jax.block_until_ready((latent, dec1, dec2))

    ref_latent, ref_dec1, ref_dec2 = mmae_reference(omics_1, omics_2, params)
    assert latent.shape == ref_latent.shape
    assert dec1.shape == ref_dec1.shape and dec2.shape == ref_dec2.shape
    # bf16 latent cast + approx-EUP reciprocal in the sigmoid -> allow ~5e-3.
    tol = dict(atol=5e-3, rtol=5e-3)
    assert jnp.allclose(latent, ref_latent, **tol), f"{name}: latent mismatch"
    assert jnp.allclose(dec1, ref_dec1, **tol), f"{name}: dec1 mismatch"
    assert jnp.allclose(dec2, ref_dec2, **tol), f"{name}: dec2 mismatch"


if __name__ == "__main__":
    key = jax.random.PRNGKey(0)
    k_small, k_tiled = jax.random.split(key)

    # Small shapes (module-consistent): exercises the grid-free fast-path
    # encoder and a single-step decoder.
    _run_case("small", B=8, in_feas_dim=[32, 48], latent_dim=16, key=k_small)

    # Larger shapes: exercises the K-tiled encoder (kt1=2, kt2=1, early
    # encoder-1 epilogue) and the N-tiled decoder.
    _run_case("tiled", B=32, in_feas_dim=[640, 384], latent_dim=32, key=k_tiled)

    print("KERNEL_OK")
</pallas_src>

<mosaic_0001>
module attributes {stable_mosaic.version = 11 : i64} {
  func.func @_decoder_kernel(%arg0: i32, %arg1: memref<16x128xbf16, #tpu.memory_space<vmem>>, %arg2: memref<128x256xbf16, #tpu.memory_space<vmem>>, %arg3: memref<1x256xf32, #tpu.memory_space<vmem>>, %arg4: memref<16x256xf32, #tpu.memory_space<vmem>>) attributes {dimension_semantics = [#tpu.dimension_semantics<parallel>], iteration_bounds = array<i64: 1>, scalar_prefetch = 0 : i64, scratch_operands = 0 : i64, tpu.core_type = #tpu.core_type<tc>, window_params = [{pipeline_mode = #tpu.pipeline_mode<synchronous>, transform_indices = @transform_0, window_bounds = array<i64: 16, 128>}, {transform_indices = @transform_1, window_bounds = array<i64: 128, 256>}, {transform_indices = @transform_2, window_bounds = array<i64: 1, 256>}, {transform_indices = @transform_3, window_bounds = array<i64: 16, 256>}]} {
    %c0 = arith.constant 0 : index
    %c0_0 = arith.constant 0 : index
    %0 = vector.load %arg1[%c0, %c0_0] : memref<16x128xbf16, #tpu.memory_space<vmem>>, vector<16x128xbf16>
    %c0_1 = arith.constant 0 : index
    %c0_2 = arith.constant 0 : index
    %1 = vector.load %arg2[%c0_1, %c0_2] : memref<128x256xbf16, #tpu.memory_space<vmem>>, vector<128x256xbf16>
    %cst = arith.constant dense<0.000000e+00> : vector<16x256xf32>
    %2 = tpu.matmul %0, %1, %cst {dimension_numbers = #tpu.dot_dimension_numbers<[1], [0], [0], [1], [0, 0, 1, 1], [], []>} : vector<16x128xbf16>, vector<128x256xbf16>, vector<16x256xf32> -> vector<16x256xf32>
    %c0_3 = arith.constant 0 : index
    %c0_4 = arith.constant 0 : index
    %3 = vector.load %arg3[%c0_3, %c0_4] : memref<1x256xf32, #tpu.memory_space<vmem>>, vector<1x256xf32>
    %4 = vector.broadcast %3 : vector<1x256xf32> to vector<16x256xf32>
    %5 = arith.addf %2, %4 : vector<16x256xf32>
    %c0_5 = arith.constant 0 : index
    %c0_6 = arith.constant 0 : index
    %6 = vector.load %arg4[%c0_5, %c0_6] : memref<16x256xf32, #tpu.memory_space<vmem>>, vector<16x256xf32>
    tpu.vector_store %arg4[%c0_5, %c0_6], %5 {strides = array<i32>} : memref<16x256xf32, #tpu.memory_space<vmem>>, vector<16x256xf32>,
    return
  }
  func.func @transform_0(%arg0: i32) -> (i32, i32) {
    %c0_i32 = arith.constant 0 : i32
    %c0_i32_0 = arith.constant 0 : i32
    %c0_i32_1 = arith.constant 0 : i32
    return %c0_i32, %c0_i32_0 : i32, i32
  }
  func.func @transform_1(%arg0: i32) -> (i32, i32) {
    %c0_i32 = arith.constant 0 : i32
    %c0_i32_0 = arith.constant 0 : i32
    return %c0_i32, %arg0 : i32, i32
  }
  func.func @transform_2(%arg0: i32) -> (i32, i32) {
    %c0_i32 = arith.constant 0 : i32
    %c0_i32_0 = arith.constant 0 : i32
    return %c0_i32, %arg0 : i32, i32
  }
  func.func @transform_3(%arg0: i32) -> (i32, i32) {
    %c0_i32 = arith.constant 0 : i32
    %c0_i32_0 = arith.constant 0 : i32
    return %c0_i32, %arg0 : i32, i32
  }
}

module attributes {stable_mosaic.version = 11 : i64} {
  func.func @_encoder_small_kernel(%arg0: memref<16x128xbf16, #tpu.memory_space<vmem>>, %arg1: memref<16x128xbf16, #tpu.memory_space<vmem>>, %arg2: memref<256x128xbf16, #tpu.memory_space<vmem>>, %arg3: memref<1x128xf32, #tpu.memory_space<vmem>>, %arg4: memref<1x128xf32, #tpu.memory_space<vmem>>, %arg5: memref<1x128xf32, #tpu.memory_space<vmem>>, %arg6: memref<1x128xf32, #tpu.memory_space<vmem>>, %arg7: memref<16x128xf32, #tpu.memory_space<vmem>>, %arg8: memref<16x128xbf16, #tpu.memory_space<vmem>>) attributes {dimension_semantics = [], scalar_prefetch = 0 : i64, scratch_operands = 0 : i64, tpu.core_type = #tpu.core_type<tc>} {
    %c0 = arith.constant 0 : index
    %c0_0 = arith.constant 0 : index
    %0 = vector.load %arg2[%c0, %c0_0] : memref<256x128xbf16, #tpu.memory_space<vmem>>, vector<128x128xbf16>
    %c128 = arith.constant 128 : index
    %c0_1 = arith.constant 0 : index
    %1 = vector.load %arg2[%c128, %c0_1] : memref<256x128xbf16, #tpu.memory_space<vmem>>, vector<128x128xbf16>
    %c0_2 = arith.constant 0 : index
    %c0_3 = arith.constant 0 : index
    %2 = vector.load %arg0[%c0_2, %c0_3] : memref<16x128xbf16, #tpu.memory_space<vmem>>, vector<16x128xbf16>
    %cst = arith.constant dense<0.000000e+00> : vector<16x128xf32>
    %3 = tpu.matmul %2, %0, %cst {dimension_numbers = #tpu.dot_dimension_numbers<[1], [0], [0], [1], [0, 0, 1, 1], [], []>} : vector<16x128xbf16>, vector<128x128xbf16>, vector<16x128xf32> -> vector<16x128xf32>
    %c0_4 = arith.constant 0 : index
    %c0_5 = arith.constant 0 : index
    %4 = vector.load %arg1[%c0_4, %c0_5] : memref<16x128xbf16, #tpu.memory_space<vmem>>, vector<16x128xbf16>
    %cst_6 = arith.constant dense<0.000000e+00> : vector<16x128xf32>
    %5 = tpu.matmul %4, %1, %cst_6 {dimension_numbers = #tpu.dot_dimension_numbers<[1], [0], [0], [1], [0, 0, 1, 1], [], []>} : vector<16x128xbf16>, vector<128x128xbf16>, vector<16x128xf32> -> vector<16x128xf32>
    %c0_7 = arith.constant 0 : index
    %c0_8 = arith.constant 0 : index
    %6 = vector.load %arg3[%c0_7, %c0_8] : memref<1x128xf32, #tpu.memory_space<vmem>>, vector<1x128xf32>
    %c0_9 = arith.constant 0 : index
    %c0_10 = arith.constant 0 : index
    %7 = vector.load %arg4[%c0_9, %c0_10] : memref<1x128xf32, #tpu.memory_space<vmem>>, vector<1x128xf32>
    %cst_11 = arith.constant dense<0.000000e+00> : vector<128xf32>
    %8 = vector.multi_reduction <add>, %3, %cst_11 [0] : vector<16x128xf32> to vector<128xf32>
    %9 = vector.shape_cast %8 : vector<128xf32> to vector<1x128xf32>
    %cst_12 = arith.constant 1.250000e-01 : f32
    %10 = vector.broadcast %cst_12 : f32 to vector<1x128xf32>
    %11 = arith.mulf %9, %10 : vector<1x128xf32>
    %12 = tpu.iota {dimensions = array<i32: 0>} : vector<16x1xi32>
    %c8_i32 = arith.constant 8 : i32
    %13 = vector.broadcast %c8_i32 : i32 to vector<16x1xi32>
    %14 = arith.cmpi slt, %12, %13 : vector<16x1xi32>
    %15 = vector.broadcast %11 : vector<1x128xf32> to vector<16x128xf32>
    %16 = arith.subf %3, %15 : vector<16x128xf32>
    %cst_13 = arith.constant 0.000000e+00 : f32
    %17 = vector.shape_cast %14 : vector<16x1xi1> to vector<16x1xi1>
    %18 = vector.broadcast %17 : vector<16x1xi1> to vector<16x128xi1>
    %19 = vector.broadcast %cst_13 : f32 to vector<16x128xf32>
    %20 = arith.select %18, %16, %19 : vector<16x128xi1>, vector<16x128xf32>
    %21 = arith.mulf %20, %20 : vector<16x128xf32>
    %cst_14 = arith.constant dense<0.000000e+00> : vector<128xf32>
    %22 = vector.multi_reduction <add>, %21, %cst_14 [0] : vector<16x128xf32> to vector<128xf32>
    %23 = vector.shape_cast %22 : vector<128xf32> to vector<1x128xf32>
    %cst_15 = arith.constant 1.250000e-01 : f32
    %24 = vector.broadcast %cst_15 : f32 to vector<1x128xf32>
    %25 = arith.mulf %23, %24 : vector<1x128xf32>
    %cst_16 = arith.constant 9.99999974E-6 : f32
    %26 = vector.broadcast %cst_16 : f32 to vector<1x128xf32>
    %27 = arith.addf %25, %26 : vector<1x128xf32>
    %28 = math.rsqrt %27 : vector<1x128xf32>
    %29 = vector.broadcast %28 : vector<1x128xf32> to vector<16x128xf32>
    %30 = arith.mulf %20, %29 : vector<16x128xf32>
    %31 = vector.broadcast %6 : vector<1x128xf32> to vector<16x128xf32>
    %32 = arith.mulf %30, %31 : vector<16x128xf32>
    %33 = vector.broadcast %7 : vector<1x128xf32> to vector<16x128xf32>
    %34 = arith.addf %32, %33 : vector<16x128xf32>
    %cst_17 = arith.constant 0.000000e+00 : f32
    %35 = vector.broadcast %cst_17 : f32 to vector<16x128xf32>
    %36 = arith.subf %35, %34 : vector<16x128xf32>
    %37 = math.exp %36 : vector<16x128xf32>
    %cst_18 = arith.constant 1.000000e+00 : f32
    %38 = vector.broadcast %cst_18 : f32 to vector<16x128xf32>
    %39 = arith.addf %38, %37 : vector<16x128xf32>
    %40 = tpu.reciprocal %39 {approx = true} : vector<16x128xf32> -> vector<16x128xf32>
    %c0_19 = arith.constant 0 : index
    %c0_20 = arith.constant 0 : index
    %41 = vector.load %arg5[%c0_19, %c0_20] : memref<1x128xf32, #tpu.memory_space<vmem>>, vector<1x128xf32>
    %c0_21 = arith.constant 0 : index
    %c0_22 = arith.constant 0 : index
    %42 = vector.load %arg6[%c0_21, %c0_22] : memref<1x128xf32, #tpu.memory_space<vmem>>, vector<1x128xf32>
    %cst_23 = arith.constant dense<0.000000e+00> : vector<128xf32>
    %43 = vector.multi_reduction <add>, %5, %cst_23 [0] : vector<16x128xf32> to vector<128xf32>
    %44 = vector.shape_cast %43 : vector<128xf32> to vector<1x128xf32>
    %cst_24 = arith.constant 1.250000e-01 : f32
    %45 = vector.broadcast %cst_24 : f32 to vector<1x128xf32>
    %46 = arith.mulf %44, %45 : vector<1x128xf32>
    %47 = tpu.iota {dimensions = array<i32: 0>} : vector<16x1xi32>
    %c8_i32_25 = arith.constant 8 : i32
    %48 = vector.broadcast %c8_i32_25 : i32 to vector<16x1xi32>
    %49 = arith.cmpi slt, %47, %48 : vector<16x1xi32>
    %50 = vector.broadcast %46 : vector<1x128xf32> to vector<16x128xf32>
    %51 = arith.subf %5, %50 : vector<16x128xf32>
    %cst_26 = arith.constant 0.000000e+00 : f32
    %52 = vector.shape_cast %49 : vector<16x1xi1> to vector<16x1xi1>
    %53 = vector.broadcast %52 : vector<16x1xi1> to vector<16x128xi1>
    %54 = vector.broadcast %cst_26 : f32 to vector<16x128xf32>
    %55 = arith.select %53, %51, %54 : vector<16x128xi1>, vector<16x128xf32>
    %56 = arith.mulf %55, %55 : vector<16x128xf32>
    %cst_27 = arith.constant dense<0.000000e+00> : vector<128xf32>
    %57 = vector.multi_reduction <add>, %56, %cst_27 [0] : vector<16x128xf32> to vector<128xf32>
    %58 = vector.shape_cast %57 : vector<128xf32> to vector<1x128xf32>
    %cst_28 = arith.constant 1.250000e-01 : f32
    %59 = vector.broadcast %cst_28 : f32 to vector<1x128xf32>
    %60 = arith.mulf %58, %59 : vector<1x128xf32>
    %cst_29 = arith.constant 9.99999974E-6 : f32
    %61 = vector.broadcast %cst_29 : f32 to vector<1x128xf32>
    %62 = arith.addf %60, %61 : vector<1x128xf32>
    %63 = math.rsqrt %62 : vector<1x128xf32>
    %64 = vector.broadcast %63 : vector<1x128xf32> to vector<16x128xf32>
    %65 = arith.mulf %55, %64 : vector<16x128xf32>
    %66 = vector.broadcast %41 : vector<1x128xf32> to vector<16x128xf32>
    %67 = arith.mulf %65, %66 : vector<16x128xf32>
    %68 = vector.broadcast %42 : vector<1x128xf32> to vector<16x128xf32>
    %69 = arith.addf %67, %68 : vector<16x128xf32>
    %cst_30 = arith.constant 0.000000e+00 : f32
    %70 = vector.broadcast %cst_30 : f32 to vector<16x128xf32>
    %71 = arith.subf %70, %69 : vector<16x128xf32>
    %72 = math.exp %71 : vector<16x128xf32>
    %cst_31 = arith.constant 1.000000e+00 : f32
    %73 = vector.broadcast %cst_31 : f32 to vector<16x128xf32>
    %74 = arith.addf %73, %72 : vector<16x128xf32>
    %75 = tpu.reciprocal %74 {approx = true} : vector<16x128xf32> -> vector<16x128xf32>
    %cst_32 = arith.constant 4.000000e-01 : f32
    %76 = vector.broadcast %cst_32 : f32 to vector<16x128xf32>
    %77 = arith.mulf %76, %40 : vector<16x128xf32>
    %cst_33 = arith.constant 3.000000e-01 : f32
    %78 = vector.broadcast %cst_33 : f32 to vector<16x128xf32>
    %79 = arith.mulf %78, %75 : vector<16x128xf32>
    %80 = arith.addf %77, %79 : vector<16x128xf32>
    %c0_34 = arith.constant 0 : index
    %c0_35 = arith.constant 0 : index
    %81 = vector.load %arg7[%c0_34, %c0_35] : memref<16x128xf32, #tpu.memory_space<vmem>>, vector<16x128xf32>
    tpu.vector_store %arg7[%c0_34, %c0_35], %80 {strides = array<i32>} : memref<16x128xf32, #tpu.memory_space<vmem>>, vector<16x128xf32>,
    %82 = arith.truncf %80 : vector<16x128xf32> to vector<16x128xbf16>
    %c0_36 = arith.constant 0 : index
    %c0_37 = arith.constant 0 : index
    %83 = vector.load %arg8[%c0_36, %c0_37] : memref<16x128xbf16, #tpu.memory_space<vmem>>, vector<16x128xbf16>
    tpu.vector_store %arg8[%c0_36, %c0_37], %82 {strides = array<i32>} : memref<16x128xbf16, #tpu.memory_space<vmem>>, vector<16x128xbf16>,
    return
  }
}

</mosaic_0001>

<bundles_post_ra>
// kernel: mmae_forward.3
= control target key start
LH: loop header
LB: loop body
LE: loop exit
PB: predicated region body
PF: predicated region fallthrough
CT: control target
= control target key end

     0   :  { %v225_v1 = vmov 0   ;;  %v35_v18 = vlaneseq  ;;  %s312_s1 = inlined_call_operand.vmem [shape: bf16[128,256], index: 1, kind: input, shape index: {}]   ;;  %s313_s0 = inlined_call_operand.vmem [shape: bf16[16,128], index: 0, kind: input, shape index: {}]   ;;  %s314_s2 = inlined_call_operand.vmem [shape: f32[1,256], index: 2, kind: input, shape index: {}]   ;;  %s315_s3 = inlined_call_operand.vmem [shape: f32[16,256], index: 3, kind: output, shape index: {}]  }
   0x1   :  { %v200_v0 = vld [vmem:[%s312_s1 + $0x74] ss:$8 sps:$4 sm:$0xff]   ;;  %163 = vmatprep.mubr.bf16.mxu0 %v225_v1  ;;  %v202_v2 = vld [vmem:[%s312_s1 + $0x70] ss:$8 sps:$4 sm:$0xff]   ;;  %v203_v3 = vld [vmem:[%s312_s1 + $0x64] ss:$8 sps:$4 sm:$0xff]  }
   0x2   :  { %131 = vmatprep.subr.bf16.mxu0 %v200_v0  ;;  %v205_v4 = vld [vmem:[%s312_s1 + $0x60] ss:$8 sps:$4 sm:$0xff]   ;;  %v206_v5 = vld [vmem:[%s312_s1 + $0x54] ss:$8 sps:$4 sm:$0xff]   ;;  %v208_v6 = vld [vmem:[%s312_s1 + $0x50] ss:$8 sps:$4 sm:$0xff]  }
   0x3   :  { %132 = vmatpush1.bf16.msra.mxu0 %v202_v2  ;;  %v209_v7 = vld [vmem:[%s312_s1 + $0x44] ss:$8 sps:$4 sm:$0xff]   ;;  %v211_v8 = vld [vmem:[%s312_s1 + $0x40] ss:$8 sps:$4 sm:$0xff]   ;;  %v212_v9 = vld [vmem:[%s312_s1 + $0x34] ss:$8 sps:$4 sm:$0xff]  }
   0x4   :  { %133 = vmatprep.subr.bf16.mxu0 %v203_v3  ;;  %v214_v10 = vld [vmem:[%s312_s1 + $0x30] ss:$8 sps:$4 sm:$0xff]   ;;  %v215_v11 = vld [vmem:[%s312_s1 + $0x24] ss:$8 sps:$4 sm:$0xff]   ;;  %v217_v12 = vld [vmem:[%s312_s1 + $0x20] ss:$8 sps:$4 sm:$0xff]  }
   0x5   :  { %v218_v13 = vld [vmem:[%s312_s1 + $0x14] ss:$8 sps:$4 sm:$0xff]   ;;  %v220_v14 = vld [vmem:[%s312_s1 + $0x10] ss:$8 sps:$4 sm:$0xff]   ;;  %v221_v15 = vld [vmem:[%s312_s1 + $0x4] ss:$8 sps:$4 sm:$0xff]  }
   0x6   :  { %v223_v16 = vld [vmem:[%s312_s1] ss:$8 sps:$4 sm:$0xff]   ;;  %v36_v19 = vshrl.u32 %v35_v18, 7 }
   0x7   :  { %134 = vmatpush1.bf16.msra.mxu0 %v205_v4  ;;  %v224_v17 = vld [vmem:[%s313_s0] sm:$0xff]  }
   0x8   :  { %135 = vmatprep.subr.bf16.mxu0 %v206_v5  ;;  %v37_v20 = vsub.s32 0, %v36_v19  ;;  %v33_v21 = vld [vmem:[%s314_s2] sm:$0x3]  ;;  %v41_v22 = vsub.s32 1, %v36_v19 }
   0xa   :  { %v38_v23 = vrot.slane %v33_v21, %v37_v20  ;;  %v42_v24 = vrot.slane %v33_v21, %v41_v22 }
   0xb   :  { %136 = vmatpush1.bf16.msra.mxu0 %v208_v6 }
   0xc   :  { %137 = vmatprep.subr.bf16.mxu0 %v209_v7 }
   0xf   :  { %138 = vmatpush1.bf16.msra.mxu0 %v211_v8 }
  0x10   :  { %139 = vmatprep.subr.bf16.mxu0 %v212_v9 }
  0x13   :  { %140 = vmatpush1.bf16.msra.mxu0 %v214_v10 }
  0x14   :  { %141 = vmatprep.subr.bf16.mxu0 %v215_v11 }
  0x17   :  { %142 = vmatpush1.bf16.msra.mxu0 %v217_v12 }
  0x18   :  { %143 = vmatprep.subr.bf16.mxu0 %v218_v13 }
  0x1b   :  { %144 = vmatpush1.bf16.msra.mxu0 %v220_v14 }
  0x1c   :  { %145 = vmatprep.subr.bf16.mxu0 %v221_v15 }
  0x1f   :  { %146 = vmatpush1.bf16.msra.mxu0 %v223_v16 }
  0x22   :  { %164 = vmatmul.mubr.bf16.vlgmr.msra.gmra.mxu0 %v224_v17 }
  0xe2   :  { %v165_v25 = vpop.f32.mrf.mxu0 }
  0xe3   :  { %v166_v26 = vadd.f32 %v165_v25, %v38_v23 }
  0xe4   :  { %v167_v27 = vpop.f32.mrf.mxu0 }
  0xe5   :  { %174 = vst [vmem:[%s315_s3] sm:$0xff] %v166_v26  ;;  %v168_v28 = vadd.f32 %v167_v27, %v42_v24 }
  0xe6   :  { %v169_v29 = vpop.f32.mrf.mxu0 }
  0xe7   :  { %175 = vst [vmem:[%s315_s3 + $0x8] sm:$0xff] %v168_v28  ;;  %v170_v30 = vadd.f32 %v169_v29, %v38_v23 }
  0xe8   :  { %v171_v31 = vpop.f32.mrf.mxu0 }
  0xe9   :  { %176 = vst [vmem:[%s315_s3 + $0x10] sm:$0xff] %v170_v30  ;;  %v172_v32 = vadd.f32 %v171_v31, %v42_v24 }
  0xeb   :  { %177 = vst [vmem:[%s315_s3 + $0x18] sm:$0xff] %v172_v32 }

// kernel: mmae_forward.2
= control target key start
LH: loop header
LB: loop body
LE: loop exit
PB: predicated region body
PF: predicated region fallthrough
CT: control target
= control target key end

     0   :  { %14 = vsyncpa [#allocation3], 0  ;;  %s787_s0 = inlined_call_operand.vmem [shape: bf16[16,128], index: 0, kind: input, shape index: {}]   ;;  %s788_s1 = inlined_call_operand.vmem [shape: bf16[16,128], index: 1, kind: input, shape index: {}]   ;;  %s789_s2 = inlined_call_operand.hbm [shape: bf16[256,128], index: 2, kind: input, shape index: {}]   ;;  %s790_s3 = inlined_call_operand.hbm [shape: f32[1,128], index: 3, kind: input, shape index: {}]   ;;  %s791_s4 = inlined_call_operand.hbm [shape: f32[1,128], index: 4, kind: input, shape index: {}]   ;;  %s792_s5 = inlined_call_operand.hbm [shape: f32[1,128], index: 5, kind: input, shape index: {}]   ;;  %s793_s6 = inlined_call_operand.hbm [shape: f32[1,128], index: 6, kind: input, shape index: {}]   ;;  %s794_s7 = inlined_call_operand.vmem [shape: f32[16,128], index: 7, kind: output, shape index: {0}]   ;;  %s795_s8 = inlined_call_operand.vmem [shape: bf16[16,128], index: 8, kind: output, shape index: {1}]  }
   0x1   :  { %15 = vsyncpa [#allocation5], 0 }
   0x2   :  { %16 = vsyncpa [#allocation8], 0  ;;  %s703_s27 = smov [#allocation4]   ;;  %s704_s29 = smov [#allocation7]  }
   0x3   :  { %s39_s28 = sshll.u32 %s703_s27, 4  ;;  %s59_s30 = sshll.u32 %s704_s29, 4  ;;  %s40_s28 = int_to_ptr.vmem [resolvable:$true] %s39_s28  ;;  %s60_s30 = int_to_ptr.vmem [resolvable:$true] %s59_s30 }
   0x4   :  { %s605_s9 = scalar_lea.vmem %s40_s28, 16  ;;  %s609_s10 = scalar_lea.vmem %s40_s28, 32 }
   0x5   :  { %p606_p0 = scmp.ne.s32.totalorder %s40_s28, %s605_s9  ;;  %p610_p1 = scmp.lt.s32.totalorder %s40_s28, %s40_s28 }
   0x6   :  { %p611_p2 = scmp.lt.s32.totalorder %s609_s10, %s605_s9 }
   0x8   :  { %p612_p3 = por %p611_p2, %p610_p1 }
   0xa   :  { %p613_p4 = pnand %p612_p3, %p606_p0 }
   0xc   :  { %616 = shalt.err (!%p613_p4)
}
   0xd   :  { %42 = dma.hbm_to_vmem [thread:$0]  %s790_s3, 16, %s40_s28, [#allocation5]  }
   0xe   :  { %s625_s13 = scalar_lea.vmem %s60_s30, 16  ;;  %s629_s14 = scalar_lea.vmem %s60_s30, 32 }
   0xf   :  { %p626_p5 = scmp.ne.s32.totalorder %s60_s30, %s625_s13  ;;  %p630_p6 = scmp.lt.s32.totalorder %s60_s30, %s60_s30 }
  0x10   :  { %p631_p7 = scmp.lt.s32.totalorder %s629_s14, %s625_s13 }
  0x12   :  { %p632_p8 = por %p631_p7, %p630_p6 }
  0x14   :  { %p633_p9 = pnand %p632_p8, %p626_p5 }
  0x16   :  { %636 = shalt.err (!%p633_p9)
}
  0x17   :  { %62 = dma.hbm_to_vmem [thread:$0]  %s792_s5, 16, %s60_s30, [#allocation8]  }
  0x18   :  { %s705_s17 = smov [#allocation2]  }
  0x19   :  { %s26_s18 = sshll.u32 %s705_s17, 4  ;;  %s27_s18 = int_to_ptr.vmem [resolvable:$true] %s26_s18 }
  0x1a   :  { %s645_s19 = scalar_lea.vmem %s27_s18, 2048  ;;  %p650_p11 = scmp.lt.s32.totalorder %s27_s18, %s27_s18 }
  0x1b   :  { %p646_p10 = scmp.ne.s32.totalorder %s27_s18, %s645_s19  ;;  %p651_p12 = scmp.lt.s32.totalorder %s645_s19, %s645_s19 }
  0x1d   :  { %p652_p13 = por %p651_p12, %p650_p11 }
  0x1f   :  { %p653_p0 = pnand %p652_p13, %p646_p10 }
  0x21   :  { %656 = shalt.err (!%p653_p0)
}
  0x22   :  { %s706_s3 = smov 64   ;;  %s707_s20 = smov 4  }
  0x23   :  { %32 = dma.hbm_to_vmem [thread:$0]  %s789_s2, 2048, %s27_s18, [#allocation3], %s706_s3, %s706_s3, %s707_s20  }
  0x24   :  { %s708_s23 = smov [#allocation6]   ;;  %s709_s5 = smov [#allocation9]  }
  0x25   :  { %s49_s24 = sshll.u32 %s708_s23, 4  ;;  %s69_s25 = sshll.u32 %s709_s5, 4  ;;  %s50_s24 = int_to_ptr.vmem [resolvable:$true] %s49_s24  ;;  %s70_s25 = int_to_ptr.vmem [resolvable:$true] %s69_s25 }
  0x26   :  { %s665_s26 = scalar_lea.vmem %s50_s24, 16  ;;  %s669_s27 = scalar_lea.vmem %s50_s24, 32 }
  0x27   :  { %p666_p1 = scmp.ne.s32.totalorder %s50_s24, %s665_s26  ;;  %p670_p2 = scmp.lt.s32.totalorder %s50_s24, %s50_s24 }
  0x28   :  { %p671_p3 = scmp.lt.s32.totalorder %s669_s27, %s665_s26 }
  0x2a   :  { %p672_p4 = por %p671_p3, %p670_p2 }
  0x2c   :  { %p673_p5 = pnand %p672_p4, %p666_p1 }
  0x2e   :  { %676 = shalt.err (!%p673_p5)
}
  0x2f   :  { %52 = dma.hbm_to_vmem [thread:$0]  %s791_s4, 16, %s50_s24, [#allocation5]  }
  0x30   :  { %s685_s30 = scalar_lea.vmem %s70_s25, 16  ;;  %s689_s2 = scalar_lea.vmem %s70_s25, 32 }
  0x31   :  { %p686_p6 = scmp.ne.s32.totalorder %s70_s25, %s685_s30  ;;  %p690_p7 = scmp.lt.s32.totalorder %s70_s25, %s70_s25 }
  0x32   :  { %p691_p8 = scmp.lt.s32.totalorder %s689_s2, %s685_s30 }
  0x34   :  { %p692_p9 = por %p691_p8, %p690_p7 }
  0x36   :  { %p693_p10 = pnand %p692_p9, %p686_p6 }
  0x38   :  { %696 = shalt.err (!%p693_p10)
}
  0x39   :  { %72 = dma.hbm_to_vmem [thread:$0]  %s793_s6, 16, %s70_s25, [#allocation8]  }
  0x3a   :  { %697 = dma.done.wait [#allocation3], 2048  }
  0x3b   :  { %698 = vsyncadd [#allocation3], 4294965248 }
  0x3c   :  { %699 = dma.done.wait [#allocation5], 32  }
  0x3d   :  { %700 = vsyncadd [#allocation5], 4294967264 }
  0x3e   :  { %701 = dma.done.wait [#allocation8], 32  }
  0x3f   :  { %702 = vsyncadd [#allocation8], 4294967264  ;;  %v710_v0 = vmov 0.0   ;;  %vm711_vm0 = vmmov 0   ;;  %v559_v1 = vld [vmem:[#allocation2 + $0x38] sm:$0xff]   ;;  %v561_v3 = vld [vmem:[#allocation2 + $0x30] sm:$0xff]  }
  0x40   :  { %510 = vmatprep.subr.bf16.mxu0 %v710_v0  ;;  %530 = vmatprep.subr.bf16.mxu1 %v710_v0  ;;  %v560_v2 = vld [vmem:[#allocation2 + $0x78] sm:$0xff]   ;;  %v562_v4 = vld [vmem:[#allocation2 + $0x70] sm:$0xff]   ;;  %v563_v5 = vld [vmem:[#allocation2 + $0x28] sm:$0xff]  }
  0x41   :  { %526 = vmatprep.mubr.msk.bf16.mxu0 %vm711_vm0, %v710_v0  ;;  %546 = vmatprep.mubr.msk.bf16.mxu1 %vm711_vm0, %v710_v0  ;;  %v564_v6 = vld [vmem:[#allocation2 + $0x68] sm:$0xff]   ;;  %v565_v7 = vld [vmem:[#allocation2 + $0x20] sm:$0xff]   ;;  %v567_v9 = vld [vmem:[#allocation2 + $0x18] sm:$0xff]  }
  0x42   :  { %511 = vmatpush3.bf16.msra.mxu0 %v559_v1  ;;  %531 = vmatpush3.bf16.msra.mxu1 %v560_v2  ;;  %v566_v8 = vld [vmem:[#allocation2 + $0x60] sm:$0xff]   ;;  %v568_v10 = vld [vmem:[#allocation2 + $0x58] sm:$0xff]   ;;  %v569_v11 = vld [vmem:[#allocation2 + $0x10] sm:$0xff]  }
  0x43   :  { %512 = vmatprep.subr.bf16.mxu0 %v710_v0  ;;  %532 = vmatprep.subr.bf16.mxu1 %v710_v0  ;;  %v570_v12 = vld [vmem:[#allocation2 + $0x50] sm:$0xff]   ;;  %v571_v13 = vld [vmem:[#allocation2 + $0x8] sm:$0xff]   ;;  %v573_v15 = vld [vmem:[#allocation2] sm:$0xff]  }
  0x44   :  { %v572_v14 = vld [vmem:[#allocation2 + $0x48] sm:$0xff]   ;;  %v574_v16 = vld [vmem:[#allocation2 + $0x40] sm:$0xff]  }
  0x45   :  { %v575_v17 = vld [vmem:[%s787_s0] sm:$0xff]  }
  0x46   :  { %513 = vmatpush3.bf16.msra.mxu0 %v561_v3  ;;  %533 = vmatpush3.bf16.msra.mxu1 %v562_v4  ;;  %v576_v18 = vld [vmem:[%s788_s1] sm:$0xff]  }
  0x47   :  { %514 = vmatprep.subr.bf16.mxu0 %v710_v0  ;;  %534 = vmatprep.subr.bf16.mxu1 %v710_v0  ;;  %v481_v4 = vld [vmem:[#allocation7] ss:$0 sm:$0xff] }
  0x4a   :  { %515 = vmatpush3.bf16.msra.mxu0 %v563_v5  ;;  %535 = vmatpush3.bf16.msra.mxu1 %v564_v6  ;;  %v480_v5 = vld [vmem:[#allocation6] ss:$0 sm:$0xff] }
  0x4b   :  { %516 = vmatprep.subr.bf16.mxu0 %v710_v0  ;;  %536 = vmatprep.subr.bf16.mxu1 %v710_v0 }
  0x4e   :  { %517 = vmatpush3.bf16.msra.mxu0 %v565_v7  ;;  %537 = vmatpush3.bf16.msra.mxu1 %v566_v8 }
  0x4f   :  { %518 = vmatprep.subr.bf16.mxu0 %v710_v0  ;;  %538 = vmatprep.subr.bf16.mxu1 %v710_v0 }
  0x52   :  { %519 = vmatpush3.bf16.msra.mxu0 %v567_v9  ;;  %539 = vmatpush3.bf16.msra.mxu1 %v568_v10  ;;  %v482_v10 = vld [vmem:[#allocation9] ss:$0 sm:$0xff] }
  0x53   :  { %520 = vmatprep.subr.bf16.mxu0 %v710_v0  ;;  %540 = vmatprep.subr.bf16.mxu1 %v710_v0 }
  0x56   :  { %521 = vmatpush3.bf16.msra.mxu0 %v569_v11  ;;  %541 = vmatpush3.bf16.msra.mxu1 %v570_v12 }
  0x57   :  { %522 = vmatprep.subr.bf16.mxu0 %v710_v0  ;;  %542 = vmatprep.subr.bf16.mxu1 %v710_v0 }
  0x5a   :  { %523 = vmatpush3.bf16.msra.mxu0 %v571_v13  ;;  %543 = vmatpush3.bf16.msra.mxu1 %v572_v14 }
  0x5b   :  { %524 = vmatprep.subr.bf16.mxu0 %v710_v0  ;;  %544 = vmatprep.subr.bf16.mxu1 %v710_v0  ;;  %v479_v0 = vld [vmem:[#allocation4] ss:$0 sm:$0xff] }
  0x5e   :  { %525 = vmatpush3.bf16.msra.mxu0 %v573_v15  ;;  %545 = vmatpush3.bf16.msra.mxu1 %v574_v16 }
  0x61   :  { %527 = vmatmul.mubr.bf16.vlgmr.msra.gmra.mxu0 %v575_v17  ;;  %547 = vmatmul.mubr.bf16.vlgmr.msra.gmra.mxu1 %v576_v18 }
 0x121   :  { %v211_v19 = vpop.f32.mrf.mxu0  ;;  %v308_v20 = vpop.f32.mrf.mxu1 }
 0x123   :  { %v528_v21 = vpop.f32.mrf.mxu0  ;;  %v548_v22 = vpop.f32.mrf.mxu1 }
 0x125   :  { %v214_v23 = vpop.f32.mrf.mxu0  ;;  %v311_v25 = vpop.f32.mrf.mxu1 }
 0x126   :  { %v317_v24 = vadd.f32 %v214_v23, %v211_v19  ;;  %v380_v26 = vadd.f32 %v311_v25, %v308_v20 }
 0x127   :  { %v529_v27 = vpop.f32.mrf.mxu0  ;;  %v549_v29 = vpop.f32.mrf.mxu1 }
 0x128   :  { %v318_v28 = vrot.slane %v317_v24, 4  ;;  %v381_v30 = vrot.slane %v380_v26, 4 }
 0x12a   :  { %v319_v31 = vadd.f32 %v318_v28, %v317_v24  ;;  %v382_v32 = vadd.f32 %v381_v30, %v380_v26 }
 0x12c   :  { %v320_v33 = vrot.slane %v319_v31, 2  ;;  %v383_v34 = vrot.slane %v382_v32, 2 }
 0x12e   :  { %v321_v35 = vadd.f32 %v320_v33, %v319_v31  ;;  %v384_v36 = vadd.f32 %v383_v34, %v382_v32 }
 0x130   :  { %v322_v37 = vrot.slane %v321_v35, 1  ;;  %v385_v38 = vrot.slane %v384_v36, 1 }
 0x132   :  { %v323_v39 = vadd.f32 %v322_v37, %v321_v35  ;;  %v386_v40 = vadd.f32 %v385_v38, %v384_v36 }
 0x134   :  { %v324_v41 = vmul.f32 0.125, %v323_v39  ;;  %v387_v42 = vmul.f32 0.125, %v386_v40 }
 0x136   :  { %v330_v43 = vsub.f32 %v211_v19, %v324_v41  ;;  %v388_v44 = vsub.f32 %v308_v20, %v387_v42 }
 0x138   :  { %v338_v45 = vmul.f32 %v330_v43, %v330_v43  ;;  %v392_v46 = vmul.f32 %v388_v44, %v388_v44 }
 0x13a   :  { %v341_v47 = vrot.slane %v338_v45, 4  ;;  %v395_v48 = vrot.slane %v392_v46, 4 }
 0x13c   :  { %v342_v49 = vadd.f32 %v341_v47, %v338_v45  ;;  %v396_v50 = vadd.f32 %v395_v48, %v392_v46 }
 0x13e   :  { %v343_v51 = vrot.slane %v342_v49, 2  ;;  %v397_v52 = vrot.slane %v396_v50, 2 }
 0x140   :  { %v344_v53 = vadd.f32 %v343_v51, %v342_v49  ;;  %v398_v54 = vadd.f32 %v397_v52, %v396_v50 }
 0x142   :  { %v345_v55 = vrot.slane %v344_v53, 1  ;;  %v399_v56 = vrot.slane %v398_v54, 1 }
 0x144   :  { %v346_v57 = vadd.f32 %v345_v55, %v344_v53  ;;  %v400_v58 = vadd.f32 %v399_v56, %v398_v54 }
 0x146   :  { %v347_v59 = vmul.f32 0.125, %v346_v57  ;;  %v401_v60 = vmul.f32 0.125, %v400_v58 }
 0x148   :  { %v348_v61 = vadd.f32 1e-05, %v347_v59  ;;  %v402_v62 = vadd.f32 1e-05, %v401_v60 }
 0x14a   :  { %577 = vrsqrt.f32 %v348_v61 }
 0x14b   :  { %579 = vrsqrt.f32 %v402_v62 }
 0x157   :  { %v578_v63 = vpop.eup %577 }
 0x158   :  { %v580_v1 = vpop.eup %579  ;;  %v350_v2 = vmul.f32 %v578_v63, %v330_v43  ;;  %v351_v3 = vmul.f32 0.0, %v578_v63 }
 0x159   :  { %v404_v6 = vmul.f32 %v580_v1, %v388_v44  ;;  %v405_v7 = vmul.f32 0.0, %v580_v1 }
 0x15a   :  { %v358_v8 = vmul.f32 %v479_v0, %v350_v2  ;;  %v359_v9 = vmul.f32 %v479_v0, %v351_v3 }
 0x15b   :  { %v412_v11 = vmul.f32 %v481_v4, %v404_v6  ;;  %v413_v12 = vmul.f32 %v481_v4, %v405_v7 }
 0x15c   :  { %v366_v13 = vadd.f32 %v480_v5, %v358_v8  ;;  %v367_v14 = vadd.f32 %v480_v5, %v359_v9 }
 0x15d   :  { %v420_v15 = vadd.f32 %v482_v10, %v412_v11  ;;  %v421_v16 = vadd.f32 %v482_v10, %v413_v12 }
 0x15e   :  { %v368_v17 = vsub.f32 0.0, %v366_v13  ;;  %v369_v18 = vsub.f32 0.0, %v367_v14 }
 0x15f   :  { %v422_v19 = vsub.f32 0.0, %v420_v15  ;;  %v423_v20 = vsub.f32 0.0, %v421_v16 }
 0x160   :  { %v370_v21 = vmul.f32 1.442695, %v368_v17  ;;  %v372_v22 = vmul.f32 1.442695, %v369_v18 }
 0x161   :  { %v424_v23 = vmul.f32 1.442695, %v422_v19  ;;  %v426_v24 = vmul.f32 1.442695, %v423_v20 }
 0x162   :  { %581 = vpow2.f32 %v370_v21 }
 0x163   :  { %583 = vpow2.f32 %v372_v22 }
 0x164   :  { %585 = vpow2.f32 %v424_v23 }
 0x165   :  { %587 = vpow2.f32 %v426_v24 }
 0x16f   :  { %v582_v25 = vpop.eup %581 }
 0x170   :  { %v584_v26 = vpop.eup %583  ;;  %v374_v27 = vadd.f32 1.0, %v582_v25 }
 0x171   :  { %v586_v28 = vpop.eup %585  ;;  %v375_v29 = vadd.f32 1.0, %v584_v26 }
 0x172   :  { %v588_v30 = vpop.eup %587  ;;  %589 = vrcp.f32 %v374_v27  ;;  %v428_v31 = vadd.f32 1.0, %v586_v28 }
 0x173   :  { %591 = vrcp.f32 %v375_v29  ;;  %v429_v32 = vadd.f32 1.0, %v588_v30 }
 0x174   :  { %593 = vrcp.f32 %v428_v31 }
 0x175   :  { %595 = vrcp.f32 %v429_v32 }
 0x17f   :  { %v590_v33 = vpop.eup %589 }
 0x180   :  { %v592_v34 = vpop.eup %591  ;;  %v432_v35 = vmul.f32 0.4, %v590_v33 }
 0x181   :  { %v594_v36 = vpop.eup %593  ;;  %v433_v37 = vmul.f32 0.4, %v592_v34 }
 0x182   :  { %v596_v38 = vpop.eup %595  ;;  %v434_v39 = vmul.f32 0.3, %v594_v36 }
 0x183   :  { %v435_v40 = vmul.f32 0.3, %v596_v38 }
 0x184   :  { %v436_v41 = vadd.f32 %v434_v39, %v432_v35 }
 0x185   :  { %v437_v42 = vadd.f32 %v435_v40, %v433_v37 }
 0x186   :  { %438 = vst [vmem:[%s794_s7] sm:$0xff] %v436_v41 }
 0x187   :  { %439 = vst [vmem:[%s794_s7 + $0x8] sm:$0xff] %v437_v42  ;;  %v490_v43 = vpack.c.bf16 %v437_v42, %v436_v41 }
 0x189   :  { %491 = vst [vmem:[%s795_s8] sm:$0xff] %v490_v43  }
 0x18a   :  { %458 = vsyncpa [#allocation3], 1 }
 0x18b   :  { %459 = vsyncpa [#allocation5], 1 }
 0x18c   :  { %460 = vsyncpa [#allocation8], 1 }

</bundles_post_ra>
